<compile_context>
chip_gen: v7x
topology: tpu7x:2x2x1
jax: 0.10.0
libtpu: 0.0.40
codegen_flags: <defaults>
</compile_context>

<pallas_src>
import functools
import math

import jax
import jax.numpy as jnp
from jax import lax
from jax.experimental import pallas as pl
from jax.experimental.pallas import tpu as pltpu


def _self_mha_kernel(x_ref, w_qkv_ref, b_qkv_ref, w_out_ref, b_out_ref,
                     o_ref, qkv_ref, ctx_ref, *, num_heads, head_dim):
    """One batch group, batch-major. x_ref: (Bblk, T, E)."""
    Bb, T, E = x_ref.shape
    rows = Bb * T

    # ---- fused QKV projection: one bf16 MXU GEMM over all Bblk*T rows. ----
    x2 = x_ref[...].reshape(rows, E).astype(jnp.bfloat16)
    qkv = jnp.dot(x2, w_qkv_ref[...], preferred_element_type=jnp.float32)
    qkv_ref[...] = (qkv + b_qkv_ref[...]).reshape(Bb, T, 3 * E)   # cols = [Q | K | V]

    # ---- attention: static loop over heads, batched over Bb inside each op. ----
    # Head offsets are static, so q/k/v/ctx are static lane slices of the scratch
    # refs; each head step processes all Bb batches at once (H body instances
    # instead of Bb*H).  Q is pre-scaled (1/sqrt(Dh) folded into W_qkv / b_qkv).
    for h in range(num_heads):
        c0 = h * head_dim
        q = qkv_ref[:, :, c0:c0 + head_dim].astype(jnp.bfloat16)              # (Bb,T,Dh)
        k = qkv_ref[:, :, E + c0:E + c0 + head_dim].astype(jnp.bfloat16)      # (Bb,T,Dh)
        v = qkv_ref[:, :, 2 * E + c0:2 * E + c0 + head_dim].astype(jnp.bfloat16)

        s = jnp.einsum('bqd,bkd->bqk', q, k,
                       preferred_element_type=jnp.float32)                    # (Bb,T,T)
        s = s - jnp.max(s, axis=-1, keepdims=True)
        p = jnp.exp(s)
        p = p * pl.reciprocal(jnp.sum(p, axis=-1, keepdims=True), approx=True)

        # "Concat heads" = batch-contiguous column write into the ctx scratch.
        ctx_ref[:, :, c0:c0 + head_dim] = jnp.einsum(
            'bqk,bkd->bqd', p.astype(jnp.bfloat16), v,
            preferred_element_type=jnp.float32)

    # ---- output projection on all rows; lane-dense (Bb, T, E) store. ----
    ctx2 = ctx_ref[...].reshape(rows, E).astype(jnp.bfloat16)
    out = jnp.dot(ctx2, w_out_ref[...], preferred_element_type=jnp.float32)
    out = out + b_out_ref[...]
    o_ref[...] = out.reshape(Bb, T, E).astype(o_ref.dtype)


def prepare_self_mha_params(w_in, b_in, w_out, b_out, num_heads):
    """One-time weight prep — cache this alongside the module parameters.

    Permutes apex's head-major [q|k|v]-interleaved W_in rows into contiguous
    [Q | K | V] blocks, folds the 1/sqrt(Dh) scaling into the Q rows, pre-transposes
    both weights, and casts them to bf16 (MXU-native on v6e/v7x, halves VMEM).
    """
    three_e, E = w_in.shape
    Dh = E // num_heads
    scaling = Dh ** (-0.5)
    perm = jnp.arange(3 * E).reshape(num_heads, 3, Dh).transpose(1, 0, 2).reshape(3 * E)
    scale = jnp.concatenate([jnp.full((E,), scaling, w_in.dtype),
                             jnp.ones((2 * E,), w_in.dtype)])
    w_qkv_t = (w_in[perm, :] * scale[:, None]).T.astype(jnp.bfloat16)     # (E, 3E)
    b_qkv = (b_in[perm] * scale).astype(jnp.float32).reshape(1, 3 * E)
    w_out_t = w_out.T.astype(jnp.bfloat16)                                # (E, E)
    b_out2 = b_out.astype(jnp.float32).reshape(1, E)
    return w_qkv_t, b_qkv, w_out_t, b_out2


def _pick_bblk(B, T, E, num_heads, budget_bytes=40 * 1024 * 1024):
    """Batch-group size: fit a v7x-safe VMEM budget, keep >=2 grid steps (2 TCs),
    and (where possible) make the projection GEMM M = T*bblk MXU-sized (>=256)."""
    def resident(bb):
        rows = bb * T
        io = 2 * 2 * rows * E * 4                        # x + out blocks, double-buffered f32
        scratch = rows * 3 * E * 4 + rows * E * 4        # qkv + ctx f32 scratch
        scores = 2 * bb * T * T * 4                      # live (Bb,T,T) s / p per head step
        weights = (3 * E * E + E * E) * 2 + 4 * E * 4    # single-buffered bf16 W + f32 biases
        return io + scratch + scores + weights

    divisors = [d for d in range(1, B + 1) if B % d == 0]
    fitting = [d for d in divisors if resident(d) <= budget_bytes] or [1]
    cand = [d for d in fitting if B // d >= 2] or fitting
    for d in sorted(cand):
        if T * d >= 256:
            return d
    return max(cand)


def self_multihead_attn(query_tbe, prepared_params, num_heads):
    """query_tbe: (T, B, E) float32 (Time x Batch x Channel, like the module).

    `prepared_params` = prepare_self_mha_params(...) — computed once per weight set.
    Returns (T, B, E).
    """
    T, B, E = query_tbe.shape
    head_dim = E // num_heads
    w_qkv_t, b_qkv, w_out_t, b_out2 = prepared_params

    bblk = _pick_bblk(B, T, E, num_heads)
    grid = (B // bblk,)

    # One HBM pass to batch-major; all in-kernel per-batch work is then contiguous.
    x_bte = jnp.transpose(query_tbe, (1, 0, 2))          # (B, T, E)

    kernel = functools.partial(_self_mha_kernel,
                               num_heads=num_heads, head_dim=head_dim)

    const = dict(pipeline_mode=pl.Buffered(1))           # single buffer for resident weights

    out_bte = pl.pallas_call(
        kernel,
        out_shape=jax.ShapeDtypeStruct((B, T, E), query_tbe.dtype),
        grid_spec=pltpu.PrefetchScalarGridSpec(
            num_scalar_prefetch=0,
            grid=grid,
            in_specs=[
                pl.BlockSpec((bblk, T, E), lambda i: (i, 0, 0)),            # x, batch-major
                pl.BlockSpec((E, 3 * E), lambda i: (0, 0), **const),        # W_qkv^T (bf16)
                pl.BlockSpec((1, 3 * E), lambda i: (0, 0), **const),        # b_qkv
                pl.BlockSpec((E, E), lambda i: (0, 0), **const),            # W_out^T (bf16)
                pl.BlockSpec((1, E), lambda i: (0, 0), **const),            # b_out
            ],
            out_specs=pl.BlockSpec((bblk, T, E), lambda i: (i, 0, 0)),
            scratch_shapes=[pltpu.VMEM((bblk, T, 3 * E), jnp.float32),      # qkv scratch
                            pltpu.VMEM((bblk, T, E), jnp.float32)],         # ctx (concat heads)
        ),
        compiler_params=pltpu.CompilerParams(
            dimension_semantics=("parallel",),
            vmem_limit_bytes=48 * 1024 * 1024),
    )(x_bte, w_qkv_t, b_qkv, w_out_t, b_out2)

    return jnp.transpose(out_bte, (1, 0, 2))             # back to (T, B, E)


def _reference(query_tbe, w_in, b_in, w_out, b_out, num_heads):
    """Pure-JAX replica of the apex forward (f32), for validation."""
    T, B, E = query_tbe.shape
    Dh = E // num_heads
    scaling = Dh ** (-0.5)
    x = query_tbe.reshape(T * B, E)
    qkv = x @ w_in.T + b_in                                   # (T*B, 3E)
    qkv = qkv.reshape(T, B * num_heads, 3, Dh)
    q = qkv[:, :, 0, :] * scaling
    k = qkv[:, :, 1, :]
    v = qkv[:, :, 2, :]
    q = jnp.transpose(q, (1, 0, 2))                           # (B*H, T, Dh)
    k = jnp.transpose(k, (1, 0, 2))
    v = jnp.transpose(v, (1, 0, 2))
    s = jnp.einsum('bqd,bkd->bqk', q, k)
    p = jax.nn.softmax(s, axis=-1)
    ctx = jnp.einsum('bqk,bkd->bqd', p, v)                    # (B*H, T, Dh)
    ctx = jnp.transpose(ctx, (1, 0, 2)).reshape(T, B, E)
    out = ctx.reshape(T * B, E) @ w_out.T + b_out
    return out.reshape(T, B, E)


def _xavier_uniform(key, shape, gain):
    fan_out, fan_in = shape
    bound = gain * math.sqrt(6.0 / (fan_in + fan_out))
    return jax.random.uniform(key, shape, jnp.float32, minval=-bound, maxval=bound)


if __name__ == "__main__":
    # Small shapes consistent with the module: seq=8, batch=2, embed=32, heads=4.
    T, B, E, H = 8, 2, 32, 4

    key = jax.random.PRNGKey(0)
    k_x, k_win, k_wout, k_bin, k_bout = jax.random.split(key, 5)

    query = jax.random.normal(k_x, (T, B, E), jnp.float32)                 # Time x Batch x Channel
    in_proj_weight = _xavier_uniform(k_win, (3 * E, E), gain=math.sqrt(2))
    out_proj_weight = _xavier_uniform(k_wout, (E, E), gain=1.0)
    # Non-zero biases so the bias permutation / scaling fold is actually exercised.
    in_proj_bias = 0.1 * jax.random.normal(k_bin, (3 * E,), jnp.float32)
    out_proj_bias = 0.1 * jax.random.normal(k_bout, (E,), jnp.float32)

    # One-time weight prep (cached with the params in a real model; not per forward).
    params = prepare_self_mha_params(in_proj_weight, in_proj_bias,
                                     out_proj_weight, out_proj_bias, H)

    out = self_multihead_attn(query, params, H)
    out = jax.block_until_ready(out)

    ref = _reference(query, in_proj_weight, in_proj_bias,
                     out_proj_weight, out_proj_bias, H)
    assert out.shape == (T, B, E)
    # Tolerance reflects bf16 MXU operands + EUP approximate reciprocal in the
    # softmax; semantic errors would be O(1), not O(1e-2).
    assert jnp.allclose(out, ref, atol=5e-2, rtol=5e-2), "mismatch vs reference"

    print("KERNEL_OK")
</pallas_src>

<mosaic_0001>
module attributes {stable_mosaic.version = 11 : i64} {
  func.func @_self_mha_kernel(%arg0: i32, %arg1: memref<1x8x32xf32, #tpu.memory_space<vmem>>, %arg2: memref<32x96xbf16, #tpu.memory_space<vmem>>, %arg3: memref<1x96xf32, #tpu.memory_space<vmem>>, %arg4: memref<32x32xbf16, #tpu.memory_space<vmem>>, %arg5: memref<1x32xf32, #tpu.memory_space<vmem>>, %arg6: memref<1x8x32xf32, #tpu.memory_space<vmem>>, %arg7: memref<1x8x96xf32, #tpu.memory_space<vmem>>, %arg8: memref<1x8x32xf32, #tpu.memory_space<vmem>>) attributes {dimension_semantics = [#tpu.dimension_semantics<parallel>], iteration_bounds = array<i64: 2>, scalar_prefetch = 0 : i64, scratch_operands = 2 : i64, tpu.core_type = #tpu.core_type<tc>, window_params = [{transform_indices = @transform_0, window_bounds = array<i64: 1, 8, 32>}, {pipeline_mode = #tpu.pipeline_mode<synchronous>, transform_indices = @transform_1, window_bounds = array<i64: 32, 96>}, {pipeline_mode = #tpu.pipeline_mode<synchronous>, transform_indices = @transform_2, window_bounds = array<i64: 1, 96>}, {pipeline_mode = #tpu.pipeline_mode<synchronous>, transform_indices = @transform_3, window_bounds = array<i64: 32, 32>}, {pipeline_mode = #tpu.pipeline_mode<synchronous>, transform_indices = @transform_4, window_bounds = array<i64: 1, 32>}, {transform_indices = @transform_5, window_bounds = array<i64: 1, 8, 32>}]} {
    %c0 = arith.constant 0 : index
    %c0_0 = arith.constant 0 : index
    %c0_1 = arith.constant 0 : index
    %0 = vector.load %arg1[%c0, %c0_0, %c0_1] : memref<1x8x32xf32, #tpu.memory_space<vmem>>, vector<1x8x32xf32>
    %1 = vector.shape_cast %0 : vector<1x8x32xf32> to vector<8x32xf32>
    %2 = arith.truncf %1 : vector<8x32xf32> to vector<8x32xbf16>
    %c0_2 = arith.constant 0 : index
    %c0_3 = arith.constant 0 : index
    %3 = vector.load %arg2[%c0_2, %c0_3] : memref<32x96xbf16, #tpu.memory_space<vmem>>, vector<32x96xbf16>
    %cst = arith.constant dense<0.000000e+00> : vector<8x96xf32>
    %4 = tpu.matmul %2, %3, %cst {dimension_numbers = #tpu.dot_dimension_numbers<[1], [0], [0], [1], [0, 0, 1, 1], [], []>} : vector<8x32xbf16>, vector<32x96xbf16>, vector<8x96xf32> -> vector<8x96xf32>
    %c0_4 = arith.constant 0 : index
    %c0_5 = arith.constant 0 : index
    %5 = vector.load %arg3[%c0_4, %c0_5] : memref<1x96xf32, #tpu.memory_space<vmem>>, vector<1x96xf32>
    %6 = vector.broadcast %5 : vector<1x96xf32> to vector<8x96xf32>
    %7 = arith.addf %4, %6 : vector<8x96xf32>
    %8 = vector.shape_cast %7 : vector<8x96xf32> to vector<1x8x96xf32>
    %c0_6 = arith.constant 0 : index
    %c0_7 = arith.constant 0 : index
    %c0_8 = arith.constant 0 : index
    %9 = vector.load %arg7[%c0_6, %c0_7, %c0_8] : memref<1x8x96xf32, #tpu.memory_space<vmem>>, vector<1x8x96xf32>
    tpu.vector_store %arg7[%c0_6, %c0_7, %c0_8], %8 {strides = array<i32>} : memref<1x8x96xf32, #tpu.memory_space<vmem>>, vector<1x8x96xf32>,
    %c0_9 = arith.constant 0 : index
    %c0_10 = arith.constant 0 : index
    %c0_11 = arith.constant 0 : index
    %10 = vector.load %arg7[%c0_9, %c0_10, %c0_11] : memref<1x8x96xf32, #tpu.memory_space<vmem>>, vector<1x8x8xf32>
    %11 = arith.truncf %10 : vector<1x8x8xf32> to vector<1x8x8xbf16>
    %c0_12 = arith.constant 0 : index
    %c0_13 = arith.constant 0 : index
    %c32 = arith.constant 32 : index
    %12 = vector.load %arg7[%c0_12, %c0_13, %c32] : memref<1x8x96xf32, #tpu.memory_space<vmem>>, vector<1x8x8xf32>
    %13 = arith.truncf %12 : vector<1x8x8xf32> to vector<1x8x8xbf16>
    %c0_14 = arith.constant 0 : index
    %c0_15 = arith.constant 0 : index
    %c64 = arith.constant 64 : index
    %14 = vector.load %arg7[%c0_14, %c0_15, %c64] : memref<1x8x96xf32, #tpu.memory_space<vmem>>, vector<1x8x8xf32>
    %15 = arith.truncf %14 : vector<1x8x8xf32> to vector<1x8x8xbf16>
    "tpu.trace_start"() <{level = 10 : i32, message = "bqd,bkd->bqk"}> : () -> ()
    %cst_16 = arith.constant dense<0.000000e+00> : vector<1x8x8xf32>
    %16 = tpu.matmul %11, %13, %cst_16 {dimension_numbers = #tpu.dot_dimension_numbers<[2], [2], [1], [1], [0, 0, 0, 1, 1, 1], [0], [0]>} : vector<1x8x8xbf16>, vector<1x8x8xbf16>, vector<1x8x8xf32> -> vector<1x8x8xf32>
    "tpu.trace_stop"() : () -> ()
    %cst_17 = arith.constant dense<0xFF800000> : vector<1x8xf32>
    %17 = vector.multi_reduction <maximumf>, %16, %cst_17 [2] : vector<1x8x8xf32> to vector<1x8xf32>
    %18 = vector.shape_cast %17 : vector<1x8xf32> to vector<1x8x1xf32>
    %19 = vector.broadcast %18 : vector<1x8x1xf32> to vector<1x8x8xf32>
    %20 = arith.subf %16, %19 : vector<1x8x8xf32>
    %21 = math.exp %20 : vector<1x8x8xf32>
    %cst_18 = arith.constant dense<0.000000e+00> : vector<1x8xf32>
    %22 = vector.multi_reduction <add>, %21, %cst_18 [2] : vector<1x8x8xf32> to vector<1x8xf32>
    %23 = vector.shape_cast %22 : vector<1x8xf32> to vector<1x8x1xf32>
    %24 = tpu.reciprocal %23 {approx = true} : vector<1x8x1xf32> -> vector<1x8x1xf32>
    %25 = vector.broadcast %24 : vector<1x8x1xf32> to vector<1x8x8xf32>
    %26 = arith.mulf %21, %25 : vector<1x8x8xf32>
    %27 = arith.truncf %26 : vector<1x8x8xf32> to vector<1x8x8xbf16>
    "tpu.trace_start"() <{level = 10 : i32, message = "bqk,bkd->bqd"}> : () -> ()
    %cst_19 = arith.constant dense<0.000000e+00> : vector<1x8x8xf32>
    %28 = tpu.matmul %27, %15, %cst_19 {dimension_numbers = #tpu.dot_dimension_numbers<[2], [1], [1], [2], [0, 0, 0, 1, 1, 2], [0], [0]>} : vector<1x8x8xbf16>, vector<1x8x8xbf16>, vector<1x8x8xf32> -> vector<1x8x8xf32>
    "tpu.trace_stop"() : () -> ()
    %c0_20 = arith.constant 0 : index
    %c0_21 = arith.constant 0 : index
    %c0_22 = arith.constant 0 : index
    %29 = vector.load %arg8[%c0_20, %c0_21, %c0_22] : memref<1x8x32xf32, #tpu.memory_space<vmem>>, vector<1x8x8xf32>
    tpu.vector_store %arg8[%c0_20, %c0_21, %c0_22], %28 {strides = array<i32>} : memref<1x8x32xf32, #tpu.memory_space<vmem>>, vector<1x8x8xf32>,
    %c0_23 = arith.constant 0 : index
    %c0_24 = arith.constant 0 : index
    %c8 = arith.constant 8 : index
    %30 = vector.load %arg7[%c0_23, %c0_24, %c8] : memref<1x8x96xf32, #tpu.memory_space<vmem>>, vector<1x8x8xf32>
    %31 = arith.truncf %30 : vector<1x8x8xf32> to vector<1x8x8xbf16>
    %c0_25 = arith.constant 0 : index
    %c0_26 = arith.constant 0 : index
    %c40 = arith.constant 40 : index
    %32 = vector.load %arg7[%c0_25, %c0_26, %c40] : memref<1x8x96xf32, #tpu.memory_space<vmem>>, vector<1x8x8xf32>
    %33 = arith.truncf %32 : vector<1x8x8xf32> to vector<1x8x8xbf16>
    %c0_27 = arith.constant 0 : index
    %c0_28 = arith.constant 0 : index
    %c72 = arith.constant 72 : index
    %34 = vector.load %arg7[%c0_27, %c0_28, %c72] : memref<1x8x96xf32, #tpu.memory_space<vmem>>, vector<1x8x8xf32>
    %35 = arith.truncf %34 : vector<1x8x8xf32> to vector<1x8x8xbf16>
    "tpu.trace_start"() <{level = 10 : i32, message = "bqd,bkd->bqk"}> : () -> ()
    %cst_29 = arith.constant dense<0.000000e+00> : vector<1x8x8xf32>
    %36 = tpu.matmul %31, %33, %cst_29 {dimension_numbers = #tpu.dot_dimension_numbers<[2], [2], [1], [1], [0, 0, 0, 1, 1, 1], [0], [0]>} : vector<1x8x8xbf16>, vector<1x8x8xbf16>, vector<1x8x8xf32> -> vector<1x8x8xf32>
    "tpu.trace_stop"() : () -> ()
    %cst_30 = arith.constant dense<0xFF800000> : vector<1x8xf32>
    %37 = vector.multi_reduction <maximumf>, %36, %cst_30 [2] : vector<1x8x8xf32> to vector<1x8xf32>
    %38 = vector.shape_cast %37 : vector<1x8xf32> to vector<1x8x1xf32>
    %39 = vector.broadcast %38 : vector<1x8x1xf32> to vector<1x8x8xf32>
    %40 = arith.subf %36, %39 : vector<1x8x8xf32>
    %41 = math.exp %40 : vector<1x8x8xf32>
    %cst_31 = arith.constant dense<0.000000e+00> : vector<1x8xf32>
    %42 = vector.multi_reduction <add>, %41, %cst_31 [2] : vector<1x8x8xf32> to vector<1x8xf32>
    %43 = vector.shape_cast %42 : vector<1x8xf32> to vector<1x8x1xf32>
    %44 = tpu.reciprocal %43 {approx = true} : vector<1x8x1xf32> -> vector<1x8x1xf32>
    %45 = vector.broadcast %44 : vector<1x8x1xf32> to vector<1x8x8xf32>
    %46 = arith.mulf %41, %45 : vector<1x8x8xf32>
    %47 = arith.truncf %46 : vector<1x8x8xf32> to vector<1x8x8xbf16>
    "tpu.trace_start"() <{level = 10 : i32, message = "bqk,bkd->bqd"}> : () -> ()
    %cst_32 = arith.constant dense<0.000000e+00> : vector<1x8x8xf32>
    %48 = tpu.matmul %47, %35, %cst_32 {dimension_numbers = #tpu.dot_dimension_numbers<[2], [1], [1], [2], [0, 0, 0, 1, 1, 2], [0], [0]>} : vector<1x8x8xbf16>, vector<1x8x8xbf16>, vector<1x8x8xf32> -> vector<1x8x8xf32>
    "tpu.trace_stop"() : () -> ()
    %c0_33 = arith.constant 0 : index
    %c0_34 = arith.constant 0 : index
    %c8_35 = arith.constant 8 : index
    %49 = vector.load %arg8[%c0_33, %c0_34, %c8_35] : memref<1x8x32xf32, #tpu.memory_space<vmem>>, vector<1x8x8xf32>
    tpu.vector_store %arg8[%c0_33, %c0_34, %c8_35], %48 {strides = array<i32>} : memref<1x8x32xf32, #tpu.memory_space<vmem>>, vector<1x8x8xf32>,
    %c0_36 = arith.constant 0 : index
    %c0_37 = arith.constant 0 : index
    %c16 = arith.constant 16 : index
    %50 = vector.load %arg7[%c0_36, %c0_37, %c16] : memref<1x8x96xf32, #tpu.memory_space<vmem>>, vector<1x8x8xf32>
    %51 = arith.truncf %50 : vector<1x8x8xf32> to vector<1x8x8xbf16>
    %c0_38 = arith.constant 0 : index
    %c0_39 = arith.constant 0 : index
    %c48 = arith.constant 48 : index
    %52 = vector.load %arg7[%c0_38, %c0_39, %c48] : memref<1x8x96xf32, #tpu.memory_space<vmem>>, vector<1x8x8xf32>
    %53 = arith.truncf %52 : vector<1x8x8xf32> to vector<1x8x8xbf16>
    %c0_40 = arith.constant 0 : index
    %c0_41 = arith.constant 0 : index
    %c80 = arith.constant 80 : index
    %54 = vector.load %arg7[%c0_40, %c0_41, %c80] : memref<1x8x96xf32, #tpu.memory_space<vmem>>, vector<1x8x8xf32>
    %55 = arith.truncf %54 : vector<1x8x8xf32> to vector<1x8x8xbf16>
    "tpu.trace_start"() <{level = 10 : i32, message = "bqd,bkd->bqk"}> : () -> ()
    %cst_42 = arith.constant dense<0.000000e+00> : vector<1x8x8xf32>
    %56 = tpu.matmul %51, %53, %cst_42 {dimension_numbers = #tpu.dot_dimension_numbers<[2], [2], [1], [1], [0, 0, 0, 1, 1, 1], [0], [0]>} : vector<1x8x8xbf16>, vector<1x8x8xbf16>, vector<1x8x8xf32> -> vector<1x8x8xf32>
    "tpu.trace_stop"() : () -> ()
    %cst_43 = arith.constant dense<0xFF800000> : vector<1x8xf32>
    %57 = vector.multi_reduction <maximumf>, %56, %cst_43 [2] : vector<1x8x8xf32> to vector<1x8xf32>
    %58 = vector.shape_cast %57 : vector<1x8xf32> to vector<1x8x1xf32>
    %59 = vector.broadcast %58 : vector<1x8x1xf32> to vector<1x8x8xf32>
    %60 = arith.subf %56, %59 : vector<1x8x8xf32>
    %61 = math.exp %60 : vector<1x8x8xf32>
    %cst_44 = arith.constant dense<0.000000e+00> : vector<1x8xf32>
    %62 = vector.multi_reduction <add>, %61, %cst_44 [2] : vector<1x8x8xf32> to vector<1x8xf32>
    %63 = vector.shape_cast %62 : vector<1x8xf32> to vector<1x8x1xf32>
    %64 = tpu.reciprocal %63 {approx = true} : vector<1x8x1xf32> -> vector<1x8x1xf32>
    %65 = vector.broadcast %64 : vector<1x8x1xf32> to vector<1x8x8xf32>
    %66 = arith.mulf %61, %65 : vector<1x8x8xf32>
    %67 = arith.truncf %66 : vector<1x8x8xf32> to vector<1x8x8xbf16>
    "tpu.trace_start"() <{level = 10 : i32, message = "bqk,bkd->bqd"}> : () -> ()
    %cst_45 = arith.constant dense<0.000000e+00> : vector<1x8x8xf32>
    %68 = tpu.matmul %67, %55, %cst_45 {dimension_numbers = #tpu.dot_dimension_numbers<[2], [1], [1], [2], [0, 0, 0, 1, 1, 2], [0], [0]>} : vector<1x8x8xbf16>, vector<1x8x8xbf16>, vector<1x8x8xf32> -> vector<1x8x8xf32>
    "tpu.trace_stop"() : () -> ()
    %c0_46 = arith.constant 0 : index
    %c0_47 = arith.constant 0 : index
    %c16_48 = arith.constant 16 : index
    %69 = vector.load %arg8[%c0_46, %c0_47, %c16_48] : memref<1x8x32xf32, #tpu.memory_space<vmem>>, vector<1x8x8xf32>
    tpu.vector_store %arg8[%c0_46, %c0_47, %c16_48], %68 {strides = array<i32>} : memref<1x8x32xf32, #tpu.memory_space<vmem>>, vector<1x8x8xf32>,
    %c0_49 = arith.constant 0 : index
    %c0_50 = arith.constant 0 : index
    %c24 = arith.constant 24 : index
    %70 = vector.load %arg7[%c0_49, %c0_50, %c24] : memref<1x8x96xf32, #tpu.memory_space<vmem>>, vector<1x8x8xf32>
    %71 = arith.truncf %70 : vector<1x8x8xf32> to vector<1x8x8xbf16>
    %c0_51 = arith.constant 0 : index
    %c0_52 = arith.constant 0 : index
    %c56 = arith.constant 56 : index
    %72 = vector.load %arg7[%c0_51, %c0_52, %c56] : memref<1x8x96xf32, #tpu.memory_space<vmem>>, vector<1x8x8xf32>
    %73 = arith.truncf %72 : vector<1x8x8xf32> to vector<1x8x8xbf16>
    %c0_53 = arith.constant 0 : index
    %c0_54 = arith.constant 0 : index
    %c88 = arith.constant 88 : index
    %74 = vector.load %arg7[%c0_53, %c0_54, %c88] : memref<1x8x96xf32, #tpu.memory_space<vmem>>, vector<1x8x8xf32>
    %75 = arith.truncf %74 : vector<1x8x8xf32> to vector<1x8x8xbf16>
    "tpu.trace_start"() <{level = 10 : i32, message = "bqd,bkd->bqk"}> : () -> ()
    %cst_55 = arith.constant dense<0.000000e+00> : vector<1x8x8xf32>
    %76 = tpu.matmul %71, %73, %cst_55 {dimension_numbers = #tpu.dot_dimension_numbers<[2], [2], [1], [1], [0, 0, 0, 1, 1, 1], [0], [0]>} : vector<1x8x8xbf16>, vector<1x8x8xbf16>, vector<1x8x8xf32> -> vector<1x8x8xf32>
    "tpu.trace_stop"() : () -> ()
    %cst_56 = arith.constant dense<0xFF800000> : vector<1x8xf32>
    %77 = vector.multi_reduction <maximumf>, %76, %cst_56 [2] : vector<1x8x8xf32> to vector<1x8xf32>
    %78 = vector.shape_cast %77 : vector<1x8xf32> to vector<1x8x1xf32>
    %79 = vector.broadcast %78 : vector<1x8x1xf32> to vector<1x8x8xf32>
    %80 = arith.subf %76, %79 : vector<1x8x8xf32>
    %81 = math.exp %80 : vector<1x8x8xf32>
    %cst_57 = arith.constant dense<0.000000e+00> : vector<1x8xf32>
    %82 = vector.multi_reduction <add>, %81, %cst_57 [2] : vector<1x8x8xf32> to vector<1x8xf32>
    %83 = vector.shape_cast %82 : vector<1x8xf32> to vector<1x8x1xf32>
    %84 = tpu.reciprocal %83 {approx = true} : vector<1x8x1xf32> -> vector<1x8x1xf32>
    %85 = vector.broadcast %84 : vector<1x8x1xf32> to vector<1x8x8xf32>
    %86 = arith.mulf %81, %85 : vector<1x8x8xf32>
    %87 = arith.truncf %86 : vector<1x8x8xf32> to vector<1x8x8xbf16>
    "tpu.trace_start"() <{level = 10 : i32, message = "bqk,bkd->bqd"}> : () -> ()
    %cst_58 = arith.constant dense<0.000000e+00> : vector<1x8x8xf32>
    %88 = tpu.matmul %87, %75, %cst_58 {dimension_numbers = #tpu.dot_dimension_numbers<[2], [1], [1], [2], [0, 0, 0, 1, 1, 2], [0], [0]>} : vector<1x8x8xbf16>, vector<1x8x8xbf16>, vector<1x8x8xf32> -> vector<1x8x8xf32>
    "tpu.trace_stop"() : () -> ()
    %c0_59 = arith.constant 0 : index
    %c0_60 = arith.constant 0 : index
    %c24_61 = arith.constant 24 : index
    %89 = vector.load %arg8[%c0_59, %c0_60, %c24_61] : memref<1x8x32xf32, #tpu.memory_space<vmem>>, vector<1x8x8xf32>
    tpu.vector_store %arg8[%c0_59, %c0_60, %c24_61], %88 {strides = array<i32>} : memref<1x8x32xf32, #tpu.memory_space<vmem>>, vector<1x8x8xf32>,
    %c0_62 = arith.constant 0 : index
    %c0_63 = arith.constant 0 : index
    %c0_64 = arith.constant 0 : index
    %90 = vector.load %arg8[%c0_62, %c0_63, %c0_64] : memref<1x8x32xf32, #tpu.memory_space<vmem>>, vector<1x8x32xf32>
    %91 = vector.shape_cast %90 : vector<1x8x32xf32> to vector<8x32xf32>
    %92 = arith.truncf %91 : vector<8x32xf32> to vector<8x32xbf16>
    %c0_65 = arith.constant 0 : index
    %c0_66 = arith.constant 0 : index
    %93 = vector.load %arg4[%c0_65, %c0_66] : memref<32x32xbf16, #tpu.memory_space<vmem>>, vector<32x32xbf16>
    %cst_67 = arith.constant dense<0.000000e+00> : vector<8x32xf32>
    %94 = tpu.matmul %92, %93, %cst_67 {dimension_numbers = #tpu.dot_dimension_numbers<[1], [0], [0], [1], [0, 0, 1, 1], [], []>} : vector<8x32xbf16>, vector<32x32xbf16>, vector<8x32xf32> -> vector<8x32xf32>
    %c0_68 = arith.constant 0 : index
    %c0_69 = arith.constant 0 : index
    %95 = vector.load %arg5[%c0_68, %c0_69] : memref<1x32xf32, #tpu.memory_space<vmem>>, vector<1x32xf32>
    %96 = vector.broadcast %95 : vector<1x32xf32> to vector<8x32xf32>
    %97 = arith.addf %94, %96 : vector<8x32xf32>
    %98 = vector.shape_cast %97 : vector<8x32xf32> to vector<1x8x32xf32>
    %c0_70 = arith.constant 0 : index
    %c0_71 = arith.constant 0 : index
    %c0_72 = arith.constant 0 : index
    %99 = vector.load %arg6[%c0_70, %c0_71, %c0_72] : memref<1x8x32xf32, #tpu.memory_space<vmem>>, vector<1x8x32xf32>
    tpu.vector_store %arg6[%c0_70, %c0_71, %c0_72], %98 {strides = array<i32>} : memref<1x8x32xf32, #tpu.memory_space<vmem>>, vector<1x8x32xf32>,
    return
  }
  func.func @transform_0(%arg0: i32) -> (i32, i32, i32) {
    %c0_i32 = arith.constant 0 : i32
    %c0_i32_0 = arith.constant 0 : i32
    %c0_i32_1 = arith.constant 0 : i32
    return %arg0, %c0_i32, %c0_i32_0 : i32, i32, i32
  }
  func.func @transform_1(%arg0: i32) -> (i32, i32) {
    %c0_i32 = arith.constant 0 : i32
    %c0_i32_0 = arith.constant 0 : i32
    %c0_i32_1 = arith.constant 0 : i32
    return %c0_i32, %c0_i32_0 : i32, i32
  }
  func.func @transform_2(%arg0: i32) -> (i32, i32) {
    %c0_i32 = arith.constant 0 : i32
    %c0_i32_0 = arith.constant 0 : i32
    %c0_i32_1 = arith.constant 0 : i32
    return %c0_i32, %c0_i32_0 : i32, i32
  }
  func.func @transform_3(%arg0: i32) -> (i32, i32) {
    %c0_i32 = arith.constant 0 : i32
    %c0_i32_0 = arith.constant 0 : i32
    %c0_i32_1 = arith.constant 0 : i32
    return %c0_i32, %c0_i32_0 : i32, i32
  }
  func.func @transform_4(%arg0: i32) -> (i32, i32) {
    %c0_i32 = arith.constant 0 : i32
    %c0_i32_0 = arith.constant 0 : i32
    %c0_i32_1 = arith.constant 0 : i32
    return %c0_i32, %c0_i32_0 : i32, i32
  }
  func.func @transform_5(%arg0: i32) -> (i32, i32, i32) {
    %c0_i32 = arith.constant 0 : i32
    %c0_i32_0 = arith.constant 0 : i32
    %c0_i32_1 = arith.constant 0 : i32
    return %arg0, %c0_i32, %c0_i32_0 : i32, i32, i32
  }
}

</mosaic_0001>

<bundles_post_ra>
// kernel: tpu_custom_call.1
= control target key start
LH: loop header
LB: loop body
LE: loop exit
PB: predicated region body
PF: predicated region fallthrough
CT: control target
= control target key end

     0   :  { %10 = vsyncpa [#allocation5], 0  ;;  %s1730_s0 = inlined_call_operand.hbm [shape: f32[2,8,32], index: 0, kind: input, shape index: {}]   ;;  %s1731_s1 = inlined_call_operand.hbm [shape: bf16[32,96], index: 1, kind: input, shape index: {}]   ;;  %s1732_s2 = inlined_call_operand.vmem [shape: f32[1,96], index: 2, kind: input, shape index: {}]   ;;  %s1733_s3 = inlined_call_operand.hbm [shape: bf16[32,32], index: 3, kind: input, shape index: {}]   ;;  %s1734_s4 = inlined_call_operand.vmem [shape: f32[1,32], index: 4, kind: input, shape index: {}]   ;;  %s1735_s5 = inlined_call_operand.hbm [shape: f32[2,8,32], index: 5, kind: output, shape index: {}]  }
   0x1   :  { %12 = vsyncpa [#allocation5 + $0x1], 0 }
   0x2   :  { %13 = vsyncpa [#allocation8], 0 }
   0x3   :  { %14 = vsyncpa [#allocation6], 0 }
   0x4   :  { %16 = vsyncpa [#allocation6 + $0x1], 0  ;;  %s1417_s18 = smov 0   ;;  %s1419_s19 = smov 0  }
   0x5   :  { %s1421_s20 = smov 0   ;;  %s1423_s21 = smov 0  }
   0x6 LB: > { %s1438_s22 = sadd.s32 4294967295, %s1363_s21   ;;  %s984_s23 = sadd.s32 4294967294, %s1363_s21   ;;  %s1363_s21 = sphi %s1423_s21, %s1755_s21   ;;  %s1359_s20 = sphi %s1421_s20, %s1754_s20   ;;  %s1355_s19 = sphi %s1419_s19, %s1753_s19   ;;  %s1351_s18 = sphi %s1417_s18, %s1752_s18  }
   0x7   : > { %p42_p0 = scmp.ne.s32.totalorder %s1355_s19, %s1351_s18  ;;  %p1736_p1 = scmp.eq.s32.totalorder %s1438_s22, 0 }
   0x8   : > { %p156_p3 = scmp.eq.s32.totalorder %s984_s23, 1  ;;  %p985_p5 = scmp.ge.s32.totalorder %s1363_s21, 1 }
   0x9   : > { %p1447_p4 = por %p1736_p1, %p42_p0  ;;  %p163_p7 = scmp.lt.s32.totalorder %s1363_s21, 3 }
   0xa   : > { %p1452_p6 = por %p156_p3, %p42_p0  ;;  %s1365_s27 = smov [#allocation7]  }
   0xb   : > { %s1739_s24 = scalar_select %p1447_p4, 1, 0 }
   0xc   : > { %s1740_s25 = scalar_select %p1452_p6, 1, 0 }
   0xd   : > { %p1457_p8 = pnand %p985_p5, %p163_p7  ;;  %s175_s28 = sshll.u32 %s1365_s27, 4  ;;  %s1461_s28 = int_to_ptr.vmem [resolvable:$true] %s175_s28 }
   0xe   : > { %s1366_s30 = smov [#allocation9]   ;;  %s1207_s9 = scalar_lea.hbm %s1731_s1, 256 }
   0xf   : > { %p1114_p9 = pneg %p1457_p8  ;;  %s191_s6 = sshll.u32 %s1366_s30, 4  ;;  %s1472_s6 = int_to_ptr.vmem [resolvable:$true] %s191_s6 }
  0x10   : > { %p1208_p12 = scmp.ne.s32.totalorder %s1731_s1, %s1207_s9  ;;  %p1214_p5 = scmp.lt.u32.totalorder %s1207_s9, %s1731_s1 }
  0x11   : > { %p1468_p11 = pnand %p1114_p9, %p1736_p1 }
  0x13   : > { %p1209_p13 = pneg %p1468_p11 }
  0x15   : > { %p1210_p0 = pnand %p1209_p13, %p1208_p12 }
  0x17   : > { %p1211_p3 = pneg %p1210_p0 }
  0x19   : > { %p1216_p7 = pnand %p1214_p5, %p1211_p3 }
  0x1b   : > { %1219 = shalt.err (!%p1216_p7)
}
  0x1c   : > { %s1220_s14 = scalar_lea.vmem %s1461_s28, 256  ;;  %p1228_p2 = scmp.lt.s32.totalorder %s1461_s28, %s1461_s28 }
  0x1d   : > { %p1221_p9 = scmp.ne.s32.totalorder %s1461_s28, %s1220_s14  ;;  %p1229_p12 = scmp.lt.s32.totalorder %s1220_s14, %s1220_s14 }
  0x1f   : > { %p1223_p10 = pnand %p1221_p9, %p1209_p13  ;;  %p1230_p0 = por %p1229_p12, %p1228_p2 }
  0x21   : > { %p1224_p1 = pneg %p1223_p10 }
  0x23   : > { %p1231_p6 = pnand %p1230_p0, %p1224_p1 }
  0x25   : > { %1234 = shalt.err (!%p1231_p6)
}
  0x26   : > { %s1367_s15 = smov 64   ;;  %s1368_s16 = smov 4  }
  0x27   : > { %1117 = dma.hbm_to_vmem [thread:$0]  (!%p1468_p11), %s1731_s1, 256, %s1461_s28, [#allocation8], %s1367_s15, %s1367_s15, %s1368_s16  }
  0x28   : > { %s1235_s7 = scalar_lea.hbm %s1733_s3, 256 }
  0x29   : > { %p1236_p2 = scmp.ne.s32.totalorder %s1733_s3, %s1235_s7  ;;  %p1242_p10 = scmp.lt.u32.totalorder %s1235_s7, %s1733_s3 }
  0x2b   : > { %p1238_p1 = pnand %p1236_p2, %p1209_p13 }
  0x2d   : > { %p1239_p6 = pneg %p1238_p1 }
  0x2f   : > { %p1244_p3 = pnand %p1242_p10, %p1239_p6 }
  0x31   : > { %1247 = shalt.err (!%p1244_p3)
}
  0x32   : > { %s1248_s28 = scalar_lea.vmem %s1472_s6, 256  ;;  %p1256_p12 = scmp.lt.s32.totalorder %s1472_s6, %s1472_s6 }
  0x33   : > { %p1249_p5 = scmp.ne.s32.totalorder %s1472_s6, %s1248_s28  ;;  %p1257_p0 = scmp.lt.s32.totalorder %s1248_s28, %s1248_s28 }
  0x35   : > { %p1251_p7 = pnand %p1249_p5, %p1209_p13  ;;  %p1258_p2 = por %p1257_p0, %p1256_p12 }
  0x37   : > { %p1252_p9 = pneg %p1251_p7 }
  0x39   : > { %p1259_p1 = pnand %p1258_p2, %p1252_p9 }
  0x3b   : > { %1262 = shalt.err (!%p1259_p1)
}
  0x3c   : > { %1120 = dma.hbm_to_vmem [thread:$0]  (!%p1468_p11), %s1733_s3, 256, %s1472_s6, [#allocation8], %s1367_s15, %s1367_s15, %s1368_s16  }
  0x3d   : > { %s1527_s14 = sadd.s32 1, %s1363_s21   ;;  %s29_s29 = sadd.s32 1, %s1359_s20 }
  0x3e   : > { %s26_s17 = ssub.s32 %s1363_s21, %s1527_s14  ;;  %p36_p13 = scmp.ne.s32.totalorder %s1359_s20, %s1355_s19 }
  0x3f   : > { %p27_p6 = scmp.eq.s32.totalorder %s26_s17, 0  ;;  %p37_p10 = scmp.eq.s32.totalorder %s1363_s21, 0 }
  0x40   : > { %p1743_p3 = scmp.eq.s32.totalorder %s1438_s22, 1  ;;  %p1131_p7 = scmp.lt.s32.totalorder %s1363_s21, 2 }
  0x41   : > { %s1543_s27 = scalar_select %p27_p6, %s1359_s20, %s29_s29  }
  0x42   : > { %p1537_p5 = por %p1743_p3, %p36_p13  ;;  %p38_p9 = por %p37_p10, %p36_p13 }
  0x43   : > { %s208_s30 = sand.u32 1, %s1359_s20   ;;  %s990_s6 = sshll.u32 %s1363_s21, 7 }
  0x44   : > { %s1744_s23 = scalar_select %p1537_p5, 1, 0 }
  0x45   : > { %s989_s7 = sshll.u32 %s208_s30, 3  ;;  %s1550_s8 = scalar_lea.hbm %s1730_s0, %s990_s6 }
  0x46   : > { %s212_s9 = scalar_lea.vmem [#allocation4], %s989_s7  ;;  %p1554_p11 = pnand %p1131_p7, %p38_p9 }
  0x47   : > { %s219_s10 = sshll.u32 %s212_s9, 4  ;;  %s209_s28 = scalar_lea.sflag [#allocation5], %s208_s30  ;;  %s1552_s10 = int_to_ptr.vmem [resolvable:$true] %s219_s10 }
  0x48   : > { %s1263_s12 = scalar_lea.hbm %s1550_s8, 128  ;;  %p1265_p0 = pneg %p1554_p11 }
  0x49   : > { %p1264_p12 = scmp.ne.s32.totalorder %s1550_s8, %s1263_s12  ;;  %s1268_s17 = scalar_lea.hbm %s1730_s0, 256 }
  0x4a   : > { %p1269_p13 = scmp.lt.u32.totalorder %s1550_s8, %s1730_s0  ;;  %p1270_p6 = scmp.lt.u32.totalorder %s1268_s17, %s1263_s12 }
  0x4b   : > { %p1266_p2 = pnand %p1265_p0, %p1264_p12  ;;  %p1272_p3 = scmp.lt.u32.totalorder %s1263_s12, %s1550_s8 }
  0x4c   : > { %p1271_p10 = por %p1270_p6, %p1269_p13 }
  0x4d   : > { %p1267_p1 = pneg %p1266_p2 }
  0x4e   : > { %p1273_p7 = por %p1272_p3, %p1271_p10 }
  0x50   : > { %p1274_p9 = pnand %p1273_p7, %p1267_p1 }
  0x52   : > { %1277 = shalt.err (!%p1274_p9)
}
  0x53   : > { %s1278_s30 = scalar_lea.vmem %s1552_s10, 128  ;;  %s1369_s15 = smov [#allocation4]  }
  0x54   : > { %p1279_p12 = scmp.ne.s32.totalorder %s1552_s10, %s1278_s30  ;;  %s1283_s16 = sshll.u32 %s1369_s15, 4  ;;  %s1284_s16 = int_to_ptr.vmem [resolvable:$false] %s1283_s16 }
  0x55   : > { %s1285_s9 = scalar_lea.vmem %s1284_s16, 256  ;;  %p1286_p4 = scmp.lt.s32.totalorder %s1552_s10, %s1284_s16 }
  0x56   : > { %p1281_p2 = pnand %p1279_p12, %p1265_p0  ;;  %p1287_p13 = scmp.lt.s32.totalorder %s1285_s9, %s1278_s30 }
  0x58   : > { %p1282_p5 = pneg %p1281_p2  ;;  %p1288_p6 = por %p1287_p13, %p1286_p4 }
  0x5a   : > { %p1289_p10 = pnand %p1288_p6, %p1282_p5 }
  0x5c   : > { %1292 = shalt.err (!%p1289_p10)
}
  0x5d   : > { %1124 = dma.hbm_to_vmem [thread:$0]  (!%p1554_p11), %s1550_s8, 128, %s1552_s10, %s209_s28  }
  0x5e   : > { %228 = sbr.rel (%p1457_p8) target bundleno = 1617 (0x651), region = 40  ;;  %s1586_s12 = sand.u32 (!%p1457_p8), 1, %s1355_s19  }
  0x5f   : > { %s992_s13 = sshll.u32 (!%p1457_p8), %s1586_s12, 3  ;;  %s231_s29 = scalar_lea.sflag (!%p1457_p8), [#allocation5], %s1586_s12 }
  0x60   : > { %s234_s17 = scalar_lea.vmem (!%p1457_p8), [#allocation4], %s992_s13  ;;  %p1746_p4 = scmp.ne.s32.totalorder (!%p1457_p8), %s1739_s24, 0 }
  0x65   : > { %1338 = dma.done.wait (%p1746_p4), %s231_s29, 128  }
  0x66   : > { %1340 = vsyncadd (%p1746_p4), %s231_s29, 4294967168  ;;  %p1747_p5 = scmp.eq.s32.totalorder %s1438_s22, 0 }
  0x68   : > { %1342 = dma.done.wait (%p1747_p5), [#allocation8], 512   ;;  %p1748_p8 = pmov %p1747_p5 }
  0x69   : > { %v1370_v0 = vmov 0.0   ;;  %vm1371_vm0 = vmmov 0   ;;  %v1187_v1 = vld [vmem:[#allocation7] sm:$0xff]   ;;  %v1188_v2 = vld [vmem:[#allocation7 + $0x8] sm:$0xff]   ;;  %v270_v3 = vld [vmem:[%s234_s17] sm:$0xff]  ;;  %vm295_vm1 = vcmask 261120  }
  0x6a   : > { %1344 = vsyncadd (%p1748_p8), [#allocation8], 4294966784  ;;  %1038 = vmatprep.subr.bf16.mxu0 %v1370_v0  ;;  %1042 = vmatprep.mubr.msk.bf16.mxu0 %vm1371_vm0, %v1370_v0  ;;  %v271_v4 = vpack.c.bf16 %v270_v3, %v270_v3  ;;  %v996_v5 = vld [vmem:[%s1732_s2] ss:$0 sm:$0xff]  ;;  %vm339_vm2 = vcmask 785408   ;;  %s1372_s8 = smov 120  }
  0x6b   : > { %1046 = vmatprep.subr.bf16.mxu1 %v1370_v0  ;;  %1048 = vmatprep.mubr.msk.bf16.mxu1 %vm1371_vm0, %v1370_v0  ;;  %s1373_s10 = smov 96   ;;  %s1374_s11 = smov 80   ;;  %vm346_vm3 = vcmask 64512   ;;  %vm410_vm4 = vcmask 1043456   ;;  %vm572_vm5 = vcmask 130112   ;;  %vm691_vm6 = vcmask 195712  }
  0x6c   : > { %1039 = vmatpush3.bf16.msra.mxu0 %v1187_v1  ;;  %s1375_s28 = smov 88   ;;  %s1376_s7 = smov 72   ;;  %vm810_vm7 = vcmask 261312  }
  0x6d   : > { %1040 = vmatprep.subr.bf16.mxu0 %v1370_v0  ;;  %s1377_s6 = smov 112   ;;  %s1378_s30 = smov 104  }
  0x6e   : > { %s1379_s15 = smov 56   ;;  %s1380_s16 = smov 64  }
  0x6f   : > { %s1381_s9 = smov 40   ;;  %s1382_s29 = smov 48  }
  0x70   : > { %1041 = vmatpush3.bf16.msra.mxu0 %v1188_v2  ;;  %s1383_s17 = smov 8   ;;  %s1384_s24 = smov 16  }
  0x71   : > { %1052 = vmatprep.subr.bf16.mxu0 %v1370_v0  ;;  %s1385_s26 = smov 24   ;;  %p1749_p0 = scmp.ne.s32.totalorder %s1744_s23, 0 }
  0x73   : > { %1043 = vmatmul.mubr.msk.bf16.vlgmr.msra.gmra.mrb[0].mxu0 %vm295_vm1, %v271_v4 }
  0x74   : > { %1054 = vmatprep.mubr.msk.bf16.mxu0 %vm1371_vm0, %v1370_v0 }
 0x146   : > { %v333_v6 = vpop.f32.mrb[0].mxu0 }
 0x147   : > { %v334_v7 = vadd.f32 %v996_v5, %v333_v6  ;;  %v1044_v8 = vpop.f32.mrb[1].mxu0 }
 0x148   : > { %v336_v9 = vpop.f32.mrb[2].mxu0 }
 0x149   : > { %340 = vst.msk [vmem:[#allocation2] sm:$0xff] %vm339_vm2, %v334_v7  ;;  %v1045_v10 = vpop.f32.mrb[3].mxu0 }
 0x150   : > { %v455_v11 = vld [vmem:[#allocation2] sm:$0xff] }
 0x151   : > { %v1614_v12 = vpack.c.bf16 %v455_v11, %v455_v11 }
 0x153   : > { %458 = vrot.lane.b32.xlu1 %v1614_v12, %s1372_s8  ;;  %344 = vrot.lane.b32.xlu0 %v1614_v12, %s1373_s10 }
 0x157   : > { %579 = vrot.lane.b32.xlu1 %v1614_v12, %s1374_s11  ;;  %460 = vrot.lane.b32.xlu0 %v1614_v12, %s1375_s28  ;;  %s1013_s11 = sshll.u32 %s1438_s22, 7  ;;  %s268_s28 = scalar_lea.vmem [#allocation10], %s992_s13 }
 0x158   : > { %s882_s22 = scalar_lea.sflag [#allocation6], %s1586_s12 }
 0x15b   : > { %698 = vrot.lane.b32.xlu1 %v1614_v12, %s1376_s7  ;;  %577 = vrot.lane.b32.xlu0 %v1614_v12, %s1377_s6  ;;  %s895_s7 = sshll.u32 %s268_s28, 4  ;;  %s1687_s7 = int_to_ptr.vmem [resolvable:$true] %s895_s7 }
 0x15c   : > { %s1293_s13 = scalar_lea.vmem %s1687_s7, 128 }
 0x15d   : > { %p1294_p11 = scmp.ne.s32.totalorder %s1687_s7, %s1293_s13 }
 0x15f   : > { %696 = vrot.lane.b32.xlu0 %v1614_v12, %s1378_s30  ;;  %p1295_p1 = pnand %p1294_p11, %p1749_p0 }
 0x161   : > { %p1296_p3 = pneg %p1295_p1 }
 0x1c5   : > { %v345_v13 = vpop.permute.xlu0 %344  ;;  %v459_v16 = vpop.permute.xlu1 %458 }
 0x1c6   : > { %v351_v14 = vsel %vm346_vm3, %v345_v13, 0 }
 0x1c7   : > { %1047 = vmatpush3.bf16.xpose.msra.mxu1 %v351_v14 }
 0x1c8   : > { %1058 = vmatprep.subr.bf16.mxu1 %v1370_v0 }
 0x1c9   : > { %v461_v15 = vpop.permute.xlu0 %460  ;;  %v580_v18 = vpop.permute.xlu1 %579 }
 0x1ca   : > { %v466_v17 = vsel %vm346_vm3, %v461_v15, 0  ;;  %v585_v19 = vsel %vm346_vm3, %v580_v18, 0 }
 0x1cd   : > { %v699_v20 = vpop.permute.xlu1 %698  ;;  %v578_v21 = vpop.permute.xlu0 %577 }
 0x1ce   : > { %1049 = vmatmul.mubr.msk.bf16.vlgmr.msra.gmra.mrb[0].mxu1 %vm346_vm3, %v1614_v12  ;;  %v704_v22 = vsel %vm346_vm3, %v699_v20, 0 }
 0x1cf   : > { %1059 = vmatpush3.bf16.xpose.msra.mxu1 %v466_v17  ;;  %1060 = vmatprep.mubr.msk.bf16.mxu1 %vm1371_vm0, %v1370_v0 }
 0x1d0   : > { %1070 = vmatprep.subr.bf16.mxu1 %v1370_v0 }
 0x1d1   : > { %v697_v23 = vpop.permute.xlu0 %696 }
 0x1d6   : > { %1061 = vmatmul.mubr.msk.bf16.vlgmr.msra.gmra.mrb[4].mxu1 %vm346_vm3, %v459_v16 }
 0x1d7   : > { %1071 = vmatpush3.bf16.xpose.msra.mxu1 %v585_v19  ;;  %1072 = vmatprep.mubr.msk.bf16.mxu1 %vm1371_vm0, %v1370_v0 }
 0x1d8   : > { %1082 = vmatprep.subr.bf16.mxu1 %v1370_v0 }
 0x1de   : > { %1073 = vmatmul.mubr.msk.bf16.vlgmr.msra.gmra.mrb[8].mxu1 %vm346_vm3, %v578_v21 }
 0x1df   : > { %1083 = vmatpush3.bf16.xpose.msra.mxu1 %v704_v22  ;;  %1084 = vmatprep.mubr.msk.bf16.mxu1 %vm1371_vm0, %v1370_v0 }
 0x1e0   : > { %1094 = vmatprep.subr.bf16.mxu1 %v1370_v0 }
 0x1e6   : > { %1085 = vmatmul.mubr.msk.bf16.vlgmr.msra.gmra.mrb[12].mxu1 %vm346_vm3, %v697_v23 }
 0x1e7   : > { %1098 = vmatprep.mubr.msk.bf16.mxu1 %vm1371_vm0, %v1370_v0 }
 0x2a1   : > { %v387_v24 = vpop.f32.mrb[0].mxu1 }
 0x2a2   : > { %v1050_v25 = vpop.f32.mrb[1].mxu1  ;;  %v393_v26 = vsel %vm346_vm3, %v387_v24, -inf }
 0x2a3   : > { %394 = vmax.xlane.f32.xlu1 %v393_v26  ;;  %v390_v27 = vpop.f32.mrb[2].mxu1 }
 0x2a4   : > { %v1051_v28 = vpop.f32.mrb[3].mxu1 }
 0x2a9   : > { %v502_v29 = vpop.f32.mrb[4].mxu1 }
 0x2aa   : > { %v1062_v30 = vpop.f32.mrb[5].mxu1  ;;  %v508_v31 = vsel %vm346_vm3, %v502_v29, -inf }
 0x2ab   : > { %509 = vmax.xlane.f32.xlu0 %v508_v31  ;;  %v505_v32 = vpop.f32.mrb[6].mxu1 }
 0x2ac   : > { %v1063_v33 = vpop.f32.mrb[7].mxu1 }
 0x2ad   : > { %v1189_v33 = vld [vmem:[#allocation9] sm:$0xff]  }
 0x2ae   : > { %1095 = vmatpush3.bf16.msra.mxu1 %v1189_v33 }
 0x2af   : > { %1096 = vmatprep.subr.bf16.mxu1 %v1370_v0 }
 0x2b1   : > { %v621_v34 = vpop.f32.mrb[8].mxu1 }
 0x2b2   : > { %v1074_v35 = vpop.f32.mrb[9].mxu1  ;;  %v627_v36 = vsel %vm346_vm3, %v621_v34, -inf }
 0x2b3   : > { %628 = vmax.xlane.f32.xlu0 %v627_v36  ;;  %v624_v37 = vpop.f32.mrb[10].mxu1 }
 0x2b4   : > { %v1075_v38 = vpop.f32.mrb[11].mxu1 }
 0x2b9   : > { %v740_v39 = vpop.f32.mrb[12].mxu1 }
 0x2ba   : > { %v1086_v40 = vpop.f32.mrb[13].mxu1  ;;  %v746_v41 = vsel %vm346_vm3, %v740_v39, -inf }
 0x2bb   : > { %747 = vmax.xlane.f32.xlu1 %v746_v41  ;;  %v743_v42 = vpop.f32.mrb[14].mxu1 }
 0x2bc   : > { %v1087_v43 = vpop.f32.mrb[15].mxu1 }
 0x330   : > { %v395_v44 = vpop.xlane.xlu1 %394 }
 0x331   : > { %v396_v45 = vsub.f32 %v387_v24, %v395_v44 }
 0x333   : > { %v397_v46 = vmul.f32 1.442695, %v396_v45 }
 0x335   : > { %1191 = vpow2.f32 %v397_v46 }
 0x338   : > { %v510_v47 = vpop.xlane.xlu0 %509 }
 0x339   : > { %v511_v48 = vsub.f32 %v502_v29, %v510_v47  ;;  %v1008_v47 = vld [vmem:[%s1734_s4] ss:$0 sm:$0xff] }
 0x33b   : > { %v512_v49 = vmul.f32 1.442695, %v511_v48 }
 0x33d   : > { %1193 = vpow2.f32 %v512_v49 }
 0x33f   : > { %v1192_v50 = vpop.eup %1191 }
 0x340   : > { %v629_v51 = vpop.xlane.xlu0 %628  ;;  %v399_v52 = vsel %vm346_vm3, %v1192_v50, 0.0 }
 0x341   : > { %v630_v53 = vsub.f32 %v621_v34, %v629_v51  ;;  %400 = vadd.xlane.f32.xlu0 %v399_v52  ;;  %v1190_v34 = vld [vmem:[#allocation9 + $0x8] sm:$0xff]  }
 0x342   : > { %1097 = vmatpush3.bf16.msra.mxu1 %v1190_v34 }
 0x343   : > { %v631_v54 = vmul.f32 1.442695, %v630_v53 }
 0x345   : > { %1195 = vpow2.f32 %v631_v54 }
 0x347   : > { %v1194_v55 = vpop.eup %1193 }
 0x348   : > { %v514_v56 = vsel %vm346_vm3, %v1194_v55, 0.0  ;;  %v748_v59 = vpop.xlane.xlu1 %747 }
 0x349   : > { %515 = vadd.xlane.f32.xlu1 %v514_v56  ;;  %v749_v60 = vsub.f32 %v740_v39, %v748_v59 }
 0x34b   : > { %v750_v61 = vmul.f32 1.442695, %v749_v60 }
 0x34d   : > { %1197 = vpow2.f32 %v750_v61 }
 0x34f   : > { %v1196_v57 = vpop.eup %1195 }
 0x350   : > { %v633_v58 = vsel %vm346_vm3, %v1196_v57, 0.0 }
 0x351   : > { %634 = vadd.xlane.f32.xlu0 %v633_v58 }
 0x357   : > { %v1198_v62 = vpop.eup %1197 }
 0x358   : > { %v752_v63 = vsel %vm346_vm3, %v1198_v62, 0.0 }
 0x35a   : > { %520 = vrot.lane.b32.xlu1 %v1614_v12, %s1379_s15  ;;  %s1685_s15 = scalar_lea.hbm %s1735_s5, %s1013_s11 }
 0x367   : > { %405 = vrot.lane.b32.xlu0 %v1614_v12, %s1380_s16  ;;  %s1386_s16 = smov [#allocation10]  }
 0x36b   : > { %758 = vrot.lane.b32.xlu0 %v1614_v12, %s1381_s9  ;;  %s1297_s9 = sshll.u32 %s1386_s16, 4  ;;  %s1298_s9 = int_to_ptr.vmem [resolvable:$false] %s1297_s9 }
 0x36c   : > { %p1300_p7 = scmp.lt.s32.totalorder %s1687_s7, %s1298_s9 }
 0x37e   : > { %753 = vadd.xlane.f32.xlu1 %v752_v63 }
 0x38f   : > { %639 = vrot.lane.b32.xlu1 %v1614_v12, %s1382_s29  ;;  %s1299_s29 = scalar_lea.vmem %s1298_s9, 256 }
 0x390   : > { %p1301_p9 = scmp.lt.s32.totalorder %s1299_s29, %s1293_s13 }
 0x392   : > { %p1302_p12 = por %p1301_p9, %p1300_p7 }
 0x394   : > { %p1303_p2 = pnand %p1302_p12, %p1296_p3 }
 0x3ce   : > { %v401_v1 = vpop.xlane.xlu0 %400 }
 0x3cf   : > { %1199 = vrcp.f32 %v401_v1 }
 0x3d6   : > { %v516_v2 = vpop.xlane.xlu1 %515 }
 0x3d7   : > { %1201 = vrcp.f32 %v516_v2 }
 0x3d9   : > { %v1200_v3 = vpop.eup %1199 }
 0x3da   : > { %v403_v5 = vmul.f32 %v1200_v3, %v1192_v50  ;;  %v521_v8 = vpop.permute.xlu1 %520 }
 0x3db   : > { %v526_v11 = vsel %vm410_vm4, %v521_v8, 0 }
 0x3dc   : > { %v404_v9 = vpack.c.bf16 %v403_v5, %v403_v5 }
 0x3de   : > { %v635_v4 = vpop.xlane.xlu0 %634 }
 0x3df   : > { %1203 = vrcp.f32 %v635_v4 }
 0x3e1   : > { %v1202_v10 = vpop.eup %1201 }
 0x3e2   : > { %v406_v6 = vpop.permute.xlu0 %405  ;;  %v518_v12 = vmul.f32 %v1202_v10, %v1194_v55 }
 0x3e3   : > { %v412_v7 = vsel %vm410_vm4, %v406_v6, 0 }
 0x3e4   : > { %1053 = vmatpush3.bf16.msra.mxu0 %v412_v7  ;;  %v519_v13 = vpack.c.bf16 %v518_v12, %v518_v12 }
 0x3e5   : > { %1064 = vmatprep.subr.bf16.mxu0 %v1370_v0 }
 0x3e6   : > { %v759_v19 = vpop.permute.xlu0 %758 }
 0x3e7   : > { %1055 = vmatmul.mubr.msk.bf16.vlgmr.msra.gmra.mrb[4].mxu0 %vm346_vm3, %v404_v9  ;;  %v764_v21 = vsel %vm410_vm4, %v759_v19, 0 }
 0x3e8   : > { %1065 = vmatpush3.bf16.msra.mxu0 %v526_v11  ;;  %1066 = vmatprep.mubr.msk.bf16.mxu0 %vm1371_vm0, %v1370_v0 }
 0x3e9   : > { %1076 = vmatprep.subr.bf16.mxu0 %v1370_v0  ;;  %v1204_v14 = vpop.eup %1203 }
 0x3ea   : > { %v637_v16 = vmul.f32 %v1204_v14, %v1196_v57 }
 0x3ec   : > { %v638_v20 = vpack.c.bf16 %v637_v16, %v637_v16 }
 0x3ef   : > { %1067 = vmatmul.mubr.msk.bf16.vlgmr.msra.gmra.mrb[8].mxu0 %vm346_vm3, %v519_v13 }
 0x3f0   : > { %1078 = vmatprep.mubr.msk.bf16.mxu0 %vm1371_vm0, %v1370_v0 }
 0x40b   : > { %v754_v15 = vpop.xlane.xlu1 %753 }
 0x40c   : > { %1205 = vrcp.f32 %v754_v15 }
 0x40f   : > { %v640_v17 = vpop.permute.xlu1 %639 }
 0x410   : > { %v645_v18 = vsel %vm410_vm4, %v640_v17, 0 }
 0x411   : > { %1077 = vmatpush3.bf16.msra.mxu0 %v645_v18 }
 0x412   : > { %1088 = vmatprep.subr.bf16.mxu0 %v1370_v0 }
 0x414   : > { %1079 = vmatmul.mubr.msk.bf16.vlgmr.msra.gmra.mrb[12].mxu0 %vm346_vm3, %v638_v20 }
 0x415   : > { %1089 = vmatpush3.bf16.msra.mxu0 %v764_v21  ;;  %1090 = vmatprep.mubr.msk.bf16.mxu0 %vm1371_vm0, %v1370_v0 }
 0x416   : > { %v1206_v22 = vpop.eup %1205 }
 0x417   : > { %v756_v23 = vmul.f32 %v1206_v22, %v1198_v62 }
 0x419   : > { %v757_v24 = vpack.c.bf16 %v756_v23, %v756_v23 }
 0x41c   : > { %1091 = vmatmul.mubr.msk.bf16.vlgmr.msra.gmra.mrb[16].mxu0 %vm346_vm3, %v757_v24 }
 0x4ba   : > { %v448_v25 = vpop.f32.mrb[4].mxu0 }
 0x4bb   : > { %454 = vst.msk [vmem:[#allocation3] sm:$0xff] %vm346_vm3, %v448_v25  ;;  %v1056_v26 = vpop.f32.mrb[5].mxu0 }
 0x4bc   : > { %v451_v27 = vpop.f32.mrb[6].mxu0 }
 0x4bd   : > { %v1057_v28 = vpop.f32.mrb[7].mxu0 }
 0x4c2   : > { %v562_v29 = vpop.f32.mrb[8].mxu0 }
 0x4c3   : > { %569 = vrot.lane.b32.xlu1 %v562_v29, %s1383_s17  ;;  %v1068_v30 = vpop.f32.mrb[9].mxu0 }
 0x4c4   : > { %v565_v31 = vpop.f32.mrb[10].mxu0 }
 0x4c5   : > { %v1069_v32 = vpop.f32.mrb[11].mxu0 }
 0x4e7   : > { %v681_v35 = vpop.f32.mrb[12].mxu0 }
 0x4e8   : > { %688 = vrot.lane.b32.xlu0 %v681_v35, %s1384_s24  ;;  %v1080_v36 = vpop.f32.mrb[13].mxu0 }
 0x4e9   : > { %v684_v37 = vpop.f32.mrb[14].mxu0 }
 0x4ea   : > { %v1081_v38 = vpop.f32.mrb[15].mxu0 }
 0x4ef   : > { %v800_v39 = vpop.f32.mrb[16].mxu0 }
 0x4f0   : > { %807 = vrot.lane.b32.xlu1 %v800_v39, %s1385_s26  ;;  %v1092_v40 = vpop.f32.mrb[17].mxu0 }
 0x4f1   : > { %v803_v41 = vpop.f32.mrb[18].mxu0 }
 0x4f2   : > { %v1093_v42 = vpop.f32.mrb[19].mxu0 }
 0x535   : > { %v570_v43 = vpop.permute.xlu1 %569 }
 0x536   : > { %573 = vst.msk [vmem:[#allocation3] sm:$0xff] %vm572_vm5, %v570_v43 }
 0x55a   : > { %v689_v0 = vpop.permute.xlu0 %688 }
 0x55b   : > { %692 = vst.msk [vmem:[#allocation3] sm:$0xff] %vm691_vm6, %v689_v0 }
 0x562   : > { %v808_v44 = vpop.permute.xlu1 %807 }
 0x563   : > { %811 = vst.msk [vmem:[#allocation3] sm:$0xff] %vm810_vm7, %v808_v44 }
 0x56a   : > { %v812_v45 = vld [vmem:[#allocation3] sm:$0xff] }
 0x56b   : > { %v813_v46 = vpack.c.bf16 %v812_v45, %v812_v45 }
 0x56d   : > { %1099 = vmatmul.mubr.msk.bf16.vlgmr.msra.gmra.mrb[16].mxu1 %vm295_vm1, %v813_v46 }
 0x640   : > { %v874_v48 = vpop.f32.mrb[16].mxu1 }
 0x641   : > { %v875_v49 = vadd.f32 %v1008_v47, %v874_v48  ;;  %v1100_v50 = vpop.f32.mrb[17].mxu1 }
 0x642   : > { %v877_v51 = vpop.f32.mrb[18].mxu1 }
 0x643   : > { %v1101_v52 = vpop.f32.mrb[19].mxu1  ;;  %880 = vst.msk [vmem:[%s268_s28] sm:$0xff] %vm295_vm1, %v875_v49 }
 0x644   : > { %1306 = shalt.err (!%p1303_p2)
}
 0x645   : > { %s1307_s12 = scalar_lea.hbm %s1685_s15, 128  ;;  %s1311_s26 = scalar_lea.hbm %s1735_s5, 256 }
 0x646   : > { %p1308_p13 = scmp.ne.s32.totalorder %s1685_s15, %s1307_s12  ;;  %p1312_p4 = scmp.lt.u32.totalorder %s1685_s15, %s1735_s5 }
 0x647   : > { %p1313_p5 = scmp.lt.u32.totalorder %s1311_s26, %s1307_s12  ;;  %p1315_p11 = scmp.lt.u32.totalorder %s1307_s12, %s1685_s15 }
 0x648   : > { %p1309_p6 = pnand %p1308_p13, %p1749_p0 }
 0x649   : > { %p1314_p8 = por %p1313_p5, %p1312_p4 }
 0x64a   : > { %p1310_p10 = pneg %p1309_p6 }
 0x64b   : > { %p1316_p1 = por %p1315_p11, %p1314_p8 }
 0x64d   : > { %p1317_p3 = pnand %p1316_p1, %p1310_p10 }
 0x64f   : > { %1320 = shalt.err (!%p1317_p3)
}
 0x650   : > { %1112 = dma.vmem_to_hbm [thread:$0]  (%p1749_p0), %s1687_s7, 128, %s1685_s15, %s882_s22  }
 0x651 PF: > { %s907_s11 = sand.u32 1, %s1351_s18   ;;  %p1750_p7 = scmp.ne.s32.totalorder %s1740_s25, 0 }
 0x652   : > { %p1751_p9 = scmp.ge.s32.totalorder %s1363_s21, 2  ;;  %s908_s28 = scalar_lea.sflag [#allocation6], %s907_s11 }
 0x654   : > { %p1126_p12 = pnand %p1751_p9, %p1750_p7 }
 0x656   : > { %1346 = dma.done.wait (!%p1126_p12), %s908_s28, 128  }
 0x657   : > { %1348 = vsyncadd (!%p1126_p12), %s908_s28, 4294967168  ;;  %p19_p2 = scmp.ge.s32.totalorder %s1527_s14, 4   ;;  %s1752_s18 = smov %s1355_s19 }
 0x658   : > { %s1753_s19 = smov %s1359_s20  ;;  %s1754_s20 = smov %s1543_s27 }
 0x659   : > { %s1755_s21 = smov %s1527_s14  ;;  %21 = sbr.rel (!%p19_p2) target bundleno = 6 (0x6), region = 93 }
 0x660   :  { %913 = vsyncpa [#allocation5], 1 }
 0x661   :  { %915 = vsyncpa [#allocation5 + $0x1], 1 }
 0x662   :  { %916 = vsyncpa [#allocation8], 1 }
 0x663   :  { %917 = vsyncpa [#allocation6], 1 }
 0x664   :  { %919 = vsyncpa [#allocation6 + $0x1], 1 }

</bundles_post_ra>
